<compile_context>
chip_gen: v5e
topology: v5e:2x2
jax: 0.10.0
libtpu: 0.0.40
codegen_flags: <defaults>
</compile_context>

<pallas_src>
import math
import jax
import jax.numpy as jnp
from jax.experimental import pallas as pl
from jax.experimental.pallas import tpu as pltpu

# ---------------- model hyper-params (small, consistent with the module) -------------
B, S, D, H, HID = 2, 8, 32, 4, 64         # batch, seq, d_model, num_heads, conv_hidden_dim
DK = D // H
EPS = 1e-6


# ---------------------------------- Pallas kernel ------------------------------------
def encoder_layer_kernel(
    x_ref,        # (B*S, D)
    wbig_ref,     # (D, 3D + D + HID) = [wq*scale | wk | wv | wh | w1]
    w2_ref,       # (HID, D)
    vec_ref,      # (8, HID): rows = bh, b1, b2, g1, be1, g2, be2, 0   (D-wide rows zero-padded)
    out_ref,      # (B*S, D)
):
    m, d = x_ref.shape
    x2 = x_ref[...].astype(jnp.float32)

    wbig = wbig_ref[...]
    wqkv = wbig[:, : 3 * d]                 # (D, 3D)  (scale already folded into Q cols)
    wh   = wbig[:, 3 * d : 4 * d]           # (D, D)
    w1   = wbig[:, 4 * d :]                 # (D, HID)

    vecs = vec_ref[...]
    bh, b1, b2 = vecs[0:1, :d], vecs[1:2, :], vecs[2:3, :d]
    g1, be1    = vecs[3:4, :d], vecs[4:5, :d]
    g2, be2    = vecs[5:6, :d], vecs[6:7, :d]

    # ---- fused QKV projection: one MXU launch ---------------------------------------
    qkv = jnp.dot(x2, wqkv, preferred_element_type=jnp.float32)   # (B*S, 3D)
    nb = m // S
    qkv3 = qkv.reshape(nb, S, 3 * d)                              # (B, S, 3D)

    # ---- multi-head self-attention (static head loop, batched over B) ---------------
    heads = []
    for h in range(H):                                            # static unroll, H=4
        qh = qkv3[:, :, h * DK:(h + 1) * DK]                      # (B, S, DK)
        kh = qkv3[:, :, d + h * DK: d + (h + 1) * DK]
        vh = qkv3[:, :, 2 * d + h * DK: 2 * d + (h + 1) * DK]
        logits = jnp.einsum("bqd,bkd->bqk", qh, kh,
                            preferred_element_type=jnp.float32)   # (B, S, S)
        logits = logits - jnp.max(logits, axis=-1, keepdims=True)
        p = jnp.exp(logits)
        a = p * pl.reciprocal(jnp.sum(p, axis=-1, keepdims=True), approx=True)
        heads.append(jnp.einsum("bqk,bkd->bqd", a, vh,
                                preferred_element_type=jnp.float32))  # (B, S, DK)

    # one lane-concat (XLU) + ONE output-projection matmul (instead of 4 + 3 adds)
    hcat = jnp.concatenate(heads, axis=-1).reshape(m, d)          # (B*S, D)
    attn = jnp.dot(hcat, wh, preferred_element_type=jnp.float32) + bh

    # ---- residual + layernorm1 (independent reductions) ------------------------------
    y1 = x2 + attn
    mu1 = jnp.mean(y1, axis=-1, keepdims=True)
    var1 = jnp.mean(y1 * y1, axis=-1, keepdims=True) - mu1 * mu1
    out1 = (y1 - mu1) * jax.lax.rsqrt(var1 + EPS) * g1 + be1

    # ---- position-wise feed-forward ("CNN") ------------------------------------------
    hdn = jnp.maximum(jnp.dot(out1, w1, preferred_element_type=jnp.float32) + b1, 0.0)
    ffn = jnp.dot(hdn, w2_ref[...], preferred_element_type=jnp.float32) + b2

    # ---- residual + layernorm2 --------------------------------------------------------
    y2 = out1 + ffn
    mu2 = jnp.mean(y2, axis=-1, keepdims=True)
    var2 = jnp.mean(y2 * y2, axis=-1, keepdims=True) - mu2 * mu2
    out2 = (y2 - mu2) * jax.lax.rsqrt(var2 + EPS) * g2 + be2

    out_ref[...] = out2.astype(out_ref.dtype)


# --------------------------------- wrapper -------------------------------------------
def pack_params(wq, wk, wv, wh, bh, w1, b1, w2, b2, g1, be1, g2, be2):
    """Pack 13 raw parameters into 3 slabs (done once, outside the kernel)."""
    scale = 1.0 / math.sqrt(DK)
    wbig = jnp.concatenate([wq * scale, wk, wv, wh, w1], axis=1)   # (D, 3D+D+HID)

    def padw(v):  # (1, D) -> (1, HID) zero-padded
        return jnp.pad(v, ((0, 0), (0, HID - v.shape[1])))

    vecs = jnp.concatenate(
        [padw(bh), b1, padw(b2), padw(g1), padw(be1), padw(g2), padw(be2),
         jnp.zeros((1, HID), jnp.float32)], axis=0)                # (8, HID)
    return wbig, w2, vecs


def encoder_layer(x, packed):
    wbig, w2, vecs = packed
    b, s, d = x.shape
    m = b * s
    x2 = x.reshape(m, d)                       # wrapper-side reshape: free

    fullspec = lambda shape: pl.BlockSpec(shape, lambda i: (0, 0))

    out2 = pl.pallas_call(
        encoder_layer_kernel,
        out_shape=jax.ShapeDtypeStruct((m, d), x.dtype),
        grid_spec=pltpu.PrefetchScalarGridSpec(
            num_scalar_prefetch=0,
            grid=(1,),                         # whole (tiny) batch in one step
            in_specs=[fullspec((m, d)),
                      fullspec(wbig.shape),
                      fullspec(w2.shape),
                      fullspec(vecs.shape)],
            out_specs=fullspec((m, d)),
        ),
        compiler_params=pltpu.CompilerParams(dimension_semantics=("arbitrary",)),
    )(x2, wbig, w2, vecs)
    return out2.reshape(b, s, d)


# --------------------------- pure-JAX reference (for checking) -----------------------
def encoder_layer_ref(x, wq, wk, wv, wh, bh, w1, b1, w2, b2, g1, be1, g2, be2):
    q = x @ wq
    k = x @ wk
    v = x @ wv

    def split(t):  # (B,S,D) -> (B,H,S,DK)
        return t.reshape(B, S, H, DK).transpose(0, 2, 1, 3)

    qh, kh, vh = split(q) / math.sqrt(DK), split(k), split(v)
    scores = jnp.einsum("bhqd,bhkd->bhqk", qh, kh)
    a = jax.nn.softmax(scores, axis=-1)
    hcat = jnp.einsum("bhqk,bhkd->bhqd", a, vh).transpose(0, 2, 1, 3).reshape(B, S, D)
    attn = hcat @ wh + bh

    def ln(y, g, be):
        mu = y.mean(-1, keepdims=True)
        var = ((y - mu) ** 2).mean(-1, keepdims=True)
        return (y - mu) / jnp.sqrt(var + EPS) * g + be

    out1 = ln(x + attn, g1, be1)
    ffn = jnp.maximum(out1 @ w1 + b1, 0.0) @ w2 + b2
    return ln(out1 + ffn, g2, be2)


# ----------------------------------- main ---------------------------------------------
if __name__ == "__main__":
    key = jax.random.PRNGKey(0)
    ks = jax.random.split(key, 10)

    x = jax.random.normal(ks[0], (B, S, D), dtype=jnp.float32)

    # Deterministic parameter init. Linear weights are stored pre-transposed (in, out)
    # so the kernel computes y = x @ W (matching PyTorch's y = x @ W.T).
    sc = 0.1
    wq = sc * jax.random.normal(ks[1], (D, D), jnp.float32)
    wk = sc * jax.random.normal(ks[2], (D, D), jnp.float32)
    wv = sc * jax.random.normal(ks[3], (D, D), jnp.float32)
    wh = sc * jax.random.normal(ks[4], (D, D), jnp.float32)
    bh = sc * jax.random.normal(ks[5], (1, D), jnp.float32)
    w1 = sc * jax.random.normal(ks[6], (D, HID), jnp.float32)
    b1 = sc * jax.random.normal(ks[7], (1, HID), jnp.float32)
    w2 = sc * jax.random.normal(ks[8], (HID, D), jnp.float32)
    b2 = sc * jax.random.normal(ks[9], (1, D), jnp.float32)
    g1 = jnp.ones((1, D), jnp.float32)
    be1 = jnp.zeros((1, D), jnp.float32)
    g2 = jnp.ones((1, D), jnp.float32)
    be2 = jnp.zeros((1, D), jnp.float32)

    packed = pack_params(wq, wk, wv, wh, bh, w1, b1, w2, b2, g1, be1, g2, be2)

    out = encoder_layer(x, packed)
    out = jax.block_until_ready(out)

    ref = encoder_layer_ref(x, wq, wk, wv, wh, bh, w1, b1, w2, b2, g1, be1, g2, be2)
    assert out.shape == (B, S, D)
    # Tolerance loosened slightly: softmax denominator uses the EUP approximate
    # reciprocal (pl.reciprocal(..., approx=True)).
    assert jnp.allclose(out, ref, rtol=5e-3, atol=5e-3), "mismatch vs reference"

    print("KERNEL_OK")
</pallas_src>

<mosaic_0001>
module attributes {stable_mosaic.version = 11 : i64} {
  func.func @encoder_layer_kernel(%arg0: i32, %arg1: memref<16x32xf32, #tpu.memory_space<vmem>>, %arg2: memref<32x192xf32, #tpu.memory_space<vmem>>, %arg3: memref<64x32xf32, #tpu.memory_space<vmem>>, %arg4: memref<8x64xf32, #tpu.memory_space<vmem>>, %arg5: memref<16x32xf32, #tpu.memory_space<vmem>>) attributes {dimension_semantics = [#tpu.dimension_semantics<arbitrary>], iteration_bounds = array<i64: 1>, scalar_prefetch = 0 : i64, scratch_operands = 0 : i64, tpu.core_type = #tpu.core_type<tc>, window_params = [{pipeline_mode = #tpu.pipeline_mode<synchronous>, transform_indices = @transform_0, window_bounds = array<i64: 16, 32>}, {pipeline_mode = #tpu.pipeline_mode<synchronous>, transform_indices = @transform_1, window_bounds = array<i64: 32, 192>}, {pipeline_mode = #tpu.pipeline_mode<synchronous>, transform_indices = @transform_2, window_bounds = array<i64: 64, 32>}, {pipeline_mode = #tpu.pipeline_mode<synchronous>, transform_indices = @transform_3, window_bounds = array<i64: 8, 64>}, {pipeline_mode = #tpu.pipeline_mode<synchronous>, transform_indices = @transform_4, window_bounds = array<i64: 16, 32>}]} {
    %c0 = arith.constant 0 : index
    %c0_0 = arith.constant 0 : index
    %0 = vector.load %arg1[%c0, %c0_0] : memref<16x32xf32, #tpu.memory_space<vmem>>, vector<16x32xf32>
    %c0_1 = arith.constant 0 : index
    %c0_2 = arith.constant 0 : index
    %1 = vector.load %arg2[%c0_1, %c0_2] : memref<32x192xf32, #tpu.memory_space<vmem>>, vector<32x192xf32>
    %2 = vector.extract_strided_slice %1 {offsets = [0, 0], sizes = [32, 96], strides = [1, 1]} : vector<32x192xf32> to vector<32x96xf32>
    %3 = vector.extract_strided_slice %1 {offsets = [0, 96], sizes = [32, 32], strides = [1, 1]} : vector<32x192xf32> to vector<32x32xf32>
    %4 = vector.extract_strided_slice %1 {offsets = [0, 128], sizes = [32, 64], strides = [1, 1]} : vector<32x192xf32> to vector<32x64xf32>
    %c0_3 = arith.constant 0 : index
    %c0_4 = arith.constant 0 : index
    %5 = vector.load %arg4[%c0_3, %c0_4] : memref<8x64xf32, #tpu.memory_space<vmem>>, vector<8x64xf32>
    %6 = vector.extract_strided_slice %5 {offsets = [0, 0], sizes = [1, 32], strides = [1, 1]} : vector<8x64xf32> to vector<1x32xf32>
    %7 = vector.extract_strided_slice %5 {offsets = [1, 0], sizes = [1, 64], strides = [1, 1]} : vector<8x64xf32> to vector<1x64xf32>
    %8 = vector.extract_strided_slice %5 {offsets = [2, 0], sizes = [1, 32], strides = [1, 1]} : vector<8x64xf32> to vector<1x32xf32>
    %9 = vector.extract_strided_slice %5 {offsets = [3, 0], sizes = [1, 32], strides = [1, 1]} : vector<8x64xf32> to vector<1x32xf32>
    %10 = vector.extract_strided_slice %5 {offsets = [4, 0], sizes = [1, 32], strides = [1, 1]} : vector<8x64xf32> to vector<1x32xf32>
    %11 = vector.extract_strided_slice %5 {offsets = [5, 0], sizes = [1, 32], strides = [1, 1]} : vector<8x64xf32> to vector<1x32xf32>
    %12 = vector.extract_strided_slice %5 {offsets = [6, 0], sizes = [1, 32], strides = [1, 1]} : vector<8x64xf32> to vector<1x32xf32>
    %cst = arith.constant dense<0.000000e+00> : vector<16x96xf32>
    %13 = tpu.matmul %0, %2, %cst {dimension_numbers = #tpu.dot_dimension_numbers<[1], [0], [0], [1], [0, 0, 1, 1], [], []>} : vector<16x32xf32>, vector<32x96xf32>, vector<16x96xf32> -> vector<16x96xf32>
    %14 = vector.shape_cast %13 : vector<16x96xf32> to vector<2x8x96xf32>
    %15 = vector.extract_strided_slice %14 {offsets = [0, 0, 0], sizes = [2, 8, 8], strides = [1, 1, 1]} : vector<2x8x96xf32> to vector<2x8x8xf32>
    %16 = vector.extract_strided_slice %14 {offsets = [0, 0, 32], sizes = [2, 8, 8], strides = [1, 1, 1]} : vector<2x8x96xf32> to vector<2x8x8xf32>
    %17 = vector.extract_strided_slice %14 {offsets = [0, 0, 64], sizes = [2, 8, 8], strides = [1, 1, 1]} : vector<2x8x96xf32> to vector<2x8x8xf32>
    "tpu.trace_start"() <{level = 10 : i32, message = "bqd,bkd->bqk"}> : () -> ()
    %cst_5 = arith.constant dense<0.000000e+00> : vector<2x8x8xf32>
    %18 = tpu.matmul %15, %16, %cst_5 {dimension_numbers = #tpu.dot_dimension_numbers<[2], [2], [1], [1], [0, 0, 0, 1, 1, 1], [0], [0]>} : vector<2x8x8xf32>, vector<2x8x8xf32>, vector<2x8x8xf32> -> vector<2x8x8xf32>
    "tpu.trace_stop"() : () -> ()
    %cst_6 = arith.constant dense<0xFF800000> : vector<2x8xf32>
    %19 = vector.multi_reduction <maximumf>, %18, %cst_6 [2] : vector<2x8x8xf32> to vector<2x8xf32>
    %20 = vector.shape_cast %19 : vector<2x8xf32> to vector<2x8x1xf32>
    %21 = vector.broadcast %20 : vector<2x8x1xf32> to vector<2x8x8xf32>
    %22 = arith.subf %18, %21 : vector<2x8x8xf32>
    %23 = math.exp %22 : vector<2x8x8xf32>
    %cst_7 = arith.constant dense<0.000000e+00> : vector<2x8xf32>
    %24 = vector.multi_reduction <add>, %23, %cst_7 [2] : vector<2x8x8xf32> to vector<2x8xf32>
    %25 = vector.shape_cast %24 : vector<2x8xf32> to vector<2x8x1xf32>
    %26 = tpu.reciprocal %25 {approx = true} : vector<2x8x1xf32> -> vector<2x8x1xf32>
    %27 = vector.broadcast %26 : vector<2x8x1xf32> to vector<2x8x8xf32>
    %28 = arith.mulf %23, %27 : vector<2x8x8xf32>
    "tpu.trace_start"() <{level = 10 : i32, message = "bqk,bkd->bqd"}> : () -> ()
    %cst_8 = arith.constant dense<0.000000e+00> : vector<2x8x8xf32>
    %29 = tpu.matmul %28, %17, %cst_8 {dimension_numbers = #tpu.dot_dimension_numbers<[2], [1], [1], [2], [0, 0, 0, 1, 1, 2], [0], [0]>} : vector<2x8x8xf32>, vector<2x8x8xf32>, vector<2x8x8xf32> -> vector<2x8x8xf32>
    "tpu.trace_stop"() : () -> ()
    %30 = vector.extract_strided_slice %14 {offsets = [0, 0, 8], sizes = [2, 8, 8], strides = [1, 1, 1]} : vector<2x8x96xf32> to vector<2x8x8xf32>
    %31 = vector.extract_strided_slice %14 {offsets = [0, 0, 40], sizes = [2, 8, 8], strides = [1, 1, 1]} : vector<2x8x96xf32> to vector<2x8x8xf32>
    %32 = vector.extract_strided_slice %14 {offsets = [0, 0, 72], sizes = [2, 8, 8], strides = [1, 1, 1]} : vector<2x8x96xf32> to vector<2x8x8xf32>
    "tpu.trace_start"() <{level = 10 : i32, message = "bqd,bkd->bqk"}> : () -> ()
    %cst_9 = arith.constant dense<0.000000e+00> : vector<2x8x8xf32>
    %33 = tpu.matmul %30, %31, %cst_9 {dimension_numbers = #tpu.dot_dimension_numbers<[2], [2], [1], [1], [0, 0, 0, 1, 1, 1], [0], [0]>} : vector<2x8x8xf32>, vector<2x8x8xf32>, vector<2x8x8xf32> -> vector<2x8x8xf32>
    "tpu.trace_stop"() : () -> ()
    %cst_10 = arith.constant dense<0xFF800000> : vector<2x8xf32>
    %34 = vector.multi_reduction <maximumf>, %33, %cst_10 [2] : vector<2x8x8xf32> to vector<2x8xf32>
    %35 = vector.shape_cast %34 : vector<2x8xf32> to vector<2x8x1xf32>
    %36 = vector.broadcast %35 : vector<2x8x1xf32> to vector<2x8x8xf32>
    %37 = arith.subf %33, %36 : vector<2x8x8xf32>
    %38 = math.exp %37 : vector<2x8x8xf32>
    %cst_11 = arith.constant dense<0.000000e+00> : vector<2x8xf32>
    %39 = vector.multi_reduction <add>, %38, %cst_11 [2] : vector<2x8x8xf32> to vector<2x8xf32>
    %40 = vector.shape_cast %39 : vector<2x8xf32> to vector<2x8x1xf32>
    %41 = tpu.reciprocal %40 {approx = true} : vector<2x8x1xf32> -> vector<2x8x1xf32>
    %42 = vector.broadcast %41 : vector<2x8x1xf32> to vector<2x8x8xf32>
    %43 = arith.mulf %38, %42 : vector<2x8x8xf32>
    "tpu.trace_start"() <{level = 10 : i32, message = "bqk,bkd->bqd"}> : () -> ()
    %cst_12 = arith.constant dense<0.000000e+00> : vector<2x8x8xf32>
    %44 = tpu.matmul %43, %32, %cst_12 {dimension_numbers = #tpu.dot_dimension_numbers<[2], [1], [1], [2], [0, 0, 0, 1, 1, 2], [0], [0]>} : vector<2x8x8xf32>, vector<2x8x8xf32>, vector<2x8x8xf32> -> vector<2x8x8xf32>
    "tpu.trace_stop"() : () -> ()
    %45 = vector.extract_strided_slice %14 {offsets = [0, 0, 16], sizes = [2, 8, 8], strides = [1, 1, 1]} : vector<2x8x96xf32> to vector<2x8x8xf32>
    %46 = vector.extract_strided_slice %14 {offsets = [0, 0, 48], sizes = [2, 8, 8], strides = [1, 1, 1]} : vector<2x8x96xf32> to vector<2x8x8xf32>
    %47 = vector.extract_strided_slice %14 {offsets = [0, 0, 80], sizes = [2, 8, 8], strides = [1, 1, 1]} : vector<2x8x96xf32> to vector<2x8x8xf32>
    "tpu.trace_start"() <{level = 10 : i32, message = "bqd,bkd->bqk"}> : () -> ()
    %cst_13 = arith.constant dense<0.000000e+00> : vector<2x8x8xf32>
    %48 = tpu.matmul %45, %46, %cst_13 {dimension_numbers = #tpu.dot_dimension_numbers<[2], [2], [1], [1], [0, 0, 0, 1, 1, 1], [0], [0]>} : vector<2x8x8xf32>, vector<2x8x8xf32>, vector<2x8x8xf32> -> vector<2x8x8xf32>
    "tpu.trace_stop"() : () -> ()
    %cst_14 = arith.constant dense<0xFF800000> : vector<2x8xf32>
    %49 = vector.multi_reduction <maximumf>, %48, %cst_14 [2] : vector<2x8x8xf32> to vector<2x8xf32>
    %50 = vector.shape_cast %49 : vector<2x8xf32> to vector<2x8x1xf32>
    %51 = vector.broadcast %50 : vector<2x8x1xf32> to vector<2x8x8xf32>
    %52 = arith.subf %48, %51 : vector<2x8x8xf32>
    %53 = math.exp %52 : vector<2x8x8xf32>
    %cst_15 = arith.constant dense<0.000000e+00> : vector<2x8xf32>
    %54 = vector.multi_reduction <add>, %53, %cst_15 [2] : vector<2x8x8xf32> to vector<2x8xf32>
    %55 = vector.shape_cast %54 : vector<2x8xf32> to vector<2x8x1xf32>
    %56 = tpu.reciprocal %55 {approx = true} : vector<2x8x1xf32> -> vector<2x8x1xf32>
    %57 = vector.broadcast %56 : vector<2x8x1xf32> to vector<2x8x8xf32>
    %58 = arith.mulf %53, %57 : vector<2x8x8xf32>
    "tpu.trace_start"() <{level = 10 : i32, message = "bqk,bkd->bqd"}> : () -> ()
    %cst_16 = arith.constant dense<0.000000e+00> : vector<2x8x8xf32>
    %59 = tpu.matmul %58, %47, %cst_16 {dimension_numbers = #tpu.dot_dimension_numbers<[2], [1], [1], [2], [0, 0, 0, 1, 1, 2], [0], [0]>} : vector<2x8x8xf32>, vector<2x8x8xf32>, vector<2x8x8xf32> -> vector<2x8x8xf32>
    "tpu.trace_stop"() : () -> ()
    %60 = vector.extract_strided_slice %14 {offsets = [0, 0, 24], sizes = [2, 8, 8], strides = [1, 1, 1]} : vector<2x8x96xf32> to vector<2x8x8xf32>
    %61 = vector.extract_strided_slice %14 {offsets = [0, 0, 56], sizes = [2, 8, 8], strides = [1, 1, 1]} : vector<2x8x96xf32> to vector<2x8x8xf32>
    %62 = vector.extract_strided_slice %14 {offsets = [0, 0, 88], sizes = [2, 8, 8], strides = [1, 1, 1]} : vector<2x8x96xf32> to vector<2x8x8xf32>
    "tpu.trace_start"() <{level = 10 : i32, message = "bqd,bkd->bqk"}> : () -> ()
    %cst_17 = arith.constant dense<0.000000e+00> : vector<2x8x8xf32>
    %63 = tpu.matmul %60, %61, %cst_17 {dimension_numbers = #tpu.dot_dimension_numbers<[2], [2], [1], [1], [0, 0, 0, 1, 1, 1], [0], [0]>} : vector<2x8x8xf32>, vector<2x8x8xf32>, vector<2x8x8xf32> -> vector<2x8x8xf32>
    "tpu.trace_stop"() : () -> ()
    %cst_18 = arith.constant dense<0xFF800000> : vector<2x8xf32>
    %64 = vector.multi_reduction <maximumf>, %63, %cst_18 [2] : vector<2x8x8xf32> to vector<2x8xf32>
    %65 = vector.shape_cast %64 : vector<2x8xf32> to vector<2x8x1xf32>
    %66 = vector.broadcast %65 : vector<2x8x1xf32> to vector<2x8x8xf32>
    %67 = arith.subf %63, %66 : vector<2x8x8xf32>
    %68 = math.exp %67 : vector<2x8x8xf32>
    %cst_19 = arith.constant dense<0.000000e+00> : vector<2x8xf32>
    %69 = vector.multi_reduction <add>, %68, %cst_19 [2] : vector<2x8x8xf32> to vector<2x8xf32>
    %70 = vector.shape_cast %69 : vector<2x8xf32> to vector<2x8x1xf32>
    %71 = tpu.reciprocal %70 {approx = true} : vector<2x8x1xf32> -> vector<2x8x1xf32>
    %72 = vector.broadcast %71 : vector<2x8x1xf32> to vector<2x8x8xf32>
    %73 = arith.mulf %68, %72 : vector<2x8x8xf32>
    "tpu.trace_start"() <{level = 10 : i32, message = "bqk,bkd->bqd"}> : () -> ()
    %cst_20 = arith.constant dense<0.000000e+00> : vector<2x8x8xf32>
    %74 = tpu.matmul %73, %62, %cst_20 {dimension_numbers = #tpu.dot_dimension_numbers<[2], [1], [1], [2], [0, 0, 0, 1, 1, 2], [0], [0]>} : vector<2x8x8xf32>, vector<2x8x8xf32>, vector<2x8x8xf32> -> vector<2x8x8xf32>
    "tpu.trace_stop"() : () -> ()
    %75 = tpu.concatenate %29, %44, %59, %74 in 2 : vector<2x8x8xf32>, vector<2x8x8xf32>, vector<2x8x8xf32>, vector<2x8x8xf32> -> vector<2x8x32xf32>
    %76 = vector.shape_cast %75 : vector<2x8x32xf32> to vector<16x32xf32>
    %cst_21 = arith.constant dense<0.000000e+00> : vector<16x32xf32>
    %77 = tpu.matmul %76, %3, %cst_21 {dimension_numbers = #tpu.dot_dimension_numbers<[1], [0], [0], [1], [0, 0, 1, 1], [], []>} : vector<16x32xf32>, vector<32x32xf32>, vector<16x32xf32> -> vector<16x32xf32>
    %78 = vector.broadcast %6 : vector<1x32xf32> to vector<16x32xf32>
    %79 = arith.addf %77, %78 : vector<16x32xf32>
    %80 = arith.addf %0, %79 : vector<16x32xf32>
    %cst_22 = arith.constant dense<0.000000e+00> : vector<16xf32>
    %81 = vector.multi_reduction <add>, %80, %cst_22 [1] : vector<16x32xf32> to vector<16xf32>
    %82 = vector.shape_cast %81 : vector<16xf32> to vector<16x1xf32>
    %cst_23 = arith.constant 3.200000e+01 : f32
    %83 = vector.broadcast %cst_23 : f32 to vector<16x1xf32>
    %84 = arith.divf %82, %83 : vector<16x1xf32>
    %85 = arith.mulf %80, %80 : vector<16x32xf32>
    %cst_24 = arith.constant dense<0.000000e+00> : vector<16xf32>
    %86 = vector.multi_reduction <add>, %85, %cst_24 [1] : vector<16x32xf32> to vector<16xf32>
    %87 = vector.shape_cast %86 : vector<16xf32> to vector<16x1xf32>
    %cst_25 = arith.constant 3.200000e+01 : f32
    %88 = vector.broadcast %cst_25 : f32 to vector<16x1xf32>
    %89 = arith.divf %87, %88 : vector<16x1xf32>
    %90 = arith.mulf %84, %84 : vector<16x1xf32>
    %91 = arith.subf %89, %90 : vector<16x1xf32>
    %92 = vector.broadcast %84 : vector<16x1xf32> to vector<16x32xf32>
    %93 = arith.subf %80, %92 : vector<16x32xf32>
    %cst_26 = arith.constant 9.99999997E-7 : f32
    %94 = vector.broadcast %cst_26 : f32 to vector<16x1xf32>
    %95 = arith.addf %91, %94 : vector<16x1xf32>
    %96 = math.rsqrt %95 : vector<16x1xf32>
    %97 = vector.broadcast %96 : vector<16x1xf32> to vector<16x32xf32>
    %98 = arith.mulf %93, %97 : vector<16x32xf32>
    %99 = vector.broadcast %9 : vector<1x32xf32> to vector<16x32xf32>
    %100 = arith.mulf %98, %99 : vector<16x32xf32>
    %101 = vector.broadcast %10 : vector<1x32xf32> to vector<16x32xf32>
    %102 = arith.addf %100, %101 : vector<16x32xf32>
    %cst_27 = arith.constant dense<0.000000e+00> : vector<16x64xf32>
    %103 = tpu.matmul %102, %4, %cst_27 {dimension_numbers = #tpu.dot_dimension_numbers<[1], [0], [0], [1], [0, 0, 1, 1], [], []>} : vector<16x32xf32>, vector<32x64xf32>, vector<16x64xf32> -> vector<16x64xf32>
    %104 = vector.broadcast %7 : vector<1x64xf32> to vector<16x64xf32>
    %105 = arith.addf %103, %104 : vector<16x64xf32>
    %cst_28 = arith.constant 0.000000e+00 : f32
    %106 = vector.broadcast %cst_28 : f32 to vector<16x64xf32>
    %107 = arith.maximumf %105, %106 : vector<16x64xf32>
    %c0_29 = arith.constant 0 : index
    %c0_30 = arith.constant 0 : index
    %108 = vector.load %arg3[%c0_29, %c0_30] : memref<64x32xf32, #tpu.memory_space<vmem>>, vector<64x32xf32>
    %cst_31 = arith.constant dense<0.000000e+00> : vector<16x32xf32>
    %109 = tpu.matmul %107, %108, %cst_31 {dimension_numbers = #tpu.dot_dimension_numbers<[1], [0], [0], [1], [0, 0, 1, 1], [], []>} : vector<16x64xf32>, vector<64x32xf32>, vector<16x32xf32> -> vector<16x32xf32>
    %110 = vector.broadcast %8 : vector<1x32xf32> to vector<16x32xf32>
    %111 = arith.addf %109, %110 : vector<16x32xf32>
    %112 = arith.addf %102, %111 : vector<16x32xf32>
    %cst_32 = arith.constant dense<0.000000e+00> : vector<16xf32>
    %113 = vector.multi_reduction <add>, %112, %cst_32 [1] : vector<16x32xf32> to vector<16xf32>
    %114 = vector.shape_cast %113 : vector<16xf32> to vector<16x1xf32>
    %cst_33 = arith.constant 3.200000e+01 : f32
    %115 = vector.broadcast %cst_33 : f32 to vector<16x1xf32>
    %116 = arith.divf %114, %115 : vector<16x1xf32>
    %117 = arith.mulf %112, %112 : vector<16x32xf32>
    %cst_34 = arith.constant dense<0.000000e+00> : vector<16xf32>
    %118 = vector.multi_reduction <add>, %117, %cst_34 [1] : vector<16x32xf32> to vector<16xf32>
    %119 = vector.shape_cast %118 : vector<16xf32> to vector<16x1xf32>
    %cst_35 = arith.constant 3.200000e+01 : f32
    %120 = vector.broadcast %cst_35 : f32 to vector<16x1xf32>
    %121 = arith.divf %119, %120 : vector<16x1xf32>
    %122 = arith.mulf %116, %116 : vector<16x1xf32>
    %123 = arith.subf %121, %122 : vector<16x1xf32>
    %124 = vector.broadcast %116 : vector<16x1xf32> to vector<16x32xf32>
    %125 = arith.subf %112, %124 : vector<16x32xf32>
    %cst_36 = arith.constant 9.99999997E-7 : f32
    %126 = vector.broadcast %cst_36 : f32 to vector<16x1xf32>
    %127 = arith.addf %123, %126 : vector<16x1xf32>
    %128 = math.rsqrt %127 : vector<16x1xf32>
    %129 = vector.broadcast %128 : vector<16x1xf32> to vector<16x32xf32>
    %130 = arith.mulf %125, %129 : vector<16x32xf32>
    %131 = vector.broadcast %11 : vector<1x32xf32> to vector<16x32xf32>
    %132 = arith.mulf %130, %131 : vector<16x32xf32>
    %133 = vector.broadcast %12 : vector<1x32xf32> to vector<16x32xf32>
    %134 = arith.addf %132, %133 : vector<16x32xf32>
    %c0_37 = arith.constant 0 : index
    %c0_38 = arith.constant 0 : index
    %135 = vector.load %arg5[%c0_37, %c0_38] : memref<16x32xf32, #tpu.memory_space<vmem>>, vector<16x32xf32>
    tpu.vector_store %arg5[%c0_37, %c0_38], %134 {strides = array<i32>} : memref<16x32xf32, #tpu.memory_space<vmem>>, vector<16x32xf32>,
    return
  }
  func.func @transform_0(%arg0: i32) -> (i32, i32) {
    %c0_i32 = arith.constant 0 : i32
    %c0_i32_0 = arith.constant 0 : i32
    %c0_i32_1 = arith.constant 0 : i32
    return %c0_i32, %c0_i32_0 : i32, i32
  }
  func.func @transform_1(%arg0: i32) -> (i32, i32) {
    %c0_i32 = arith.constant 0 : i32
    %c0_i32_0 = arith.constant 0 : i32
    %c0_i32_1 = arith.constant 0 : i32
    return %c0_i32, %c0_i32_0 : i32, i32
  }
  func.func @transform_2(%arg0: i32) -> (i32, i32) {
    %c0_i32 = arith.constant 0 : i32
    %c0_i32_0 = arith.constant 0 : i32
    %c0_i32_1 = arith.constant 0 : i32
    return %c0_i32, %c0_i32_0 : i32, i32
  }
  func.func @transform_3(%arg0: i32) -> (i32, i32) {
    %c0_i32 = arith.constant 0 : i32
    %c0_i32_0 = arith.constant 0 : i32
    %c0_i32_1 = arith.constant 0 : i32
    return %c0_i32, %c0_i32_0 : i32, i32
  }
  func.func @transform_4(%arg0: i32) -> (i32, i32) {
    %c0_i32 = arith.constant 0 : i32
    %c0_i32_0 = arith.constant 0 : i32
    %c0_i32_1 = arith.constant 0 : i32
    return %c0_i32, %c0_i32_0 : i32, i32
  }
}

</mosaic_0001>

<bundles_post_ra>
// kernel: tpu_custom_call.1
= control target key start
LH: loop header
LB: loop body
LE: loop exit
PB: predicated region body
PF: predicated region fallthrough
CT: control target
= control target key end

     0   :  { %s1271_s0 = inlined_call_operand.vmem [shape: f32[16,32], index: 0, kind: input, shape index: {}]   ;;  %s1272_s1 = inlined_call_operand.vmem [shape: f32[32,192], index: 1, kind: input, shape index: {}]   ;;  %s1273_s2 = inlined_call_operand.vmem [shape: f32[64,32], index: 2, kind: input, shape index: {}]   ;;  %s1274_s3 = inlined_call_operand.vmem [shape: f32[8,64], index: 3, kind: input, shape index: {}]   ;;  %s1275_s4 = inlined_call_operand.hbm [shape: f32[16,32], index: 4, kind: output, shape index: {}]  }
   0x1   :  { %v1045_v0 = vld [vmem:[%s1272_s1 + $0x30] sm:$0xff]  ;;  %v1050_v1 = vld [vmem:[%s1272_s1 + $0x20] sm:$0xff] }
   0x2   :  { %48 = vmatpush.msra.mxu0 %v1045_v0  ;;  %v921_v2 = vpack.i.bf16 %v1050_v1, %v1045_v0  ;;  %v1058_v3 = vld [vmem:[%s1272_s1 + $0x10] sm:$0xff]  ;;  %v1063_v4 = vld [vmem:[%s1272_s1] sm:$0xff] }
   0x3   :  { %v926_v5 = vpack.i.bf16 %v1063_v4, %v1058_v3 }
   0x4   :  { %9 = vsyncpa [#allocation3], 0  ;;  %49 = vmatpush.msra.mxu0 %v1050_v1  ;;  %v1072_v6 = vld [vmem:[%s1271_s0] sm:$0xff]  ;;  %vm29_vm0 = vcmask 261120   ;;  %v1080_v7 = vld [vmem:[%s1271_s0 + $0x8] sm:$0xff]  ;;  %s999_s27 = smov 64  }
   0x5   :  { %s1000_s28 = smov 96   ;;  %s1001_s29 = smov 88   ;;  %vm62_vm1 = vcmask 64512   ;;  %vm604_vm2 = vcmask 130048   ;;  %vm607_vm3 = vcmask 195584   ;;  %vm760_vm11 = vcmask 523264  }
   0x6   :  { %50 = vmatpush.msra.mxu0 %v1058_v3  ;;  %s1002_s0 = smov 120   ;;  %s1003_s30 = smov 72  }
   0x7   :  { %s1004_s5 = smov 80   ;;  %s1005_s6 = smov 112  }
   0x8   :  { %51 = vmatpush.msra.mxu0 %v1063_v4  ;;  %s1006_s7 = smov 104   ;;  %s1007_s8 = smov 56  }
   0x9   :  { %866 = vmatmul.msk.f32.vlgmr.msra.gmra.mxu0 %vm29_vm0, %v1072_v6  ;;  %s1008_s9 = smov 40   ;;  %s1009_s10 = smov 48  }
   0xa   :  { %s1010_s11 = smov 32   ;;  %s1011_s12 = smov 8  }
   0xb   :  { %s1012_s13 = smov 16   ;;  %s1013_s14 = smov 24  }
   0xc   :  { %s854_s16 = sshll.u32 %s1275_s4, 4  ;;  %s855_s16 = int_to_ptr.hbm [resolvable:$true] %s854_s16 }
  0x11   :  { %867 = vmatmul.msk.f32.gmra.mxu0 %vm29_vm0, %v1080_v7 }
  0x86   :  { %v1084_v8 = vpop.f32.mrf.mxu0 }
  0x87   :  { %136 = vrot.lane.b32.xlu2 %v1084_v8, %s999_s27  ;;  %60 = vrot.lane.b32.xlu0 %v1084_v8, %s1000_s28 }
  0x8e   :  { %v1089_v9 = vpop.f32.mrf.mxu0 }
  0x8f   :  { %218 = vrot.lane.b32.xlu2 %v1089_v9, %s1001_s29  ;;  %88 = vrot.lane.b32.xlu1 %v1089_v9, %s1000_s28 }
  0x97   :  { %216 = vrot.lane.b32.xlu2 %v1089_v9, %s1002_s0  ;;  %188 = vrot.lane.b32.xlu1 %v1084_v8, %s1002_s0 }
  0x9f   :  { %190 = vrot.lane.b32.xlu2 %v1084_v8, %s1001_s29  ;;  %450 = vrot.lane.b32.xlu1 %v1084_v8, %s1003_s30 }
  0xa7   :  { %320 = vrot.lane.b32.xlu2 %v1084_v8, %s1004_s5 }
  0xaf   :  { %318 = vrot.lane.b32.xlu2 %v1084_v8, %s1005_s6 }
  0xb7   :  { %448 = vrot.lane.b32.xlu2 %v1084_v8, %s1006_s7 }
  0xbf   :  { %478 = vrot.lane.b32.xlu2 %v1089_v9, %s1003_s30 }
  0xe1   :  { %v137_v10 = vpop.permute.xlu2 %136 }
  0xe9   :  { %v219_v11 = vpop.permute.xlu2 %218 }
  0xf1   :  { %v217_v12 = vpop.permute.xlu2 %216 }
  0xf9   :  { %v61_v13 = vpop.permute.xlu0 %60  ;;  %v191_v14 = vpop.permute.xlu2 %190 }
  0xfa   :  { %868 = vmatpush.xpose.msk.msra.mxu1 %vm62_vm1, %v61_v13 }
  0xfd   :  { %869 = vmatmul.msk.f32.vlgmr.msra.gmra.mxu1 %vm62_vm1, %v1084_v8 }
  0xfe   :  { %157 = vmatpush.msrb.mxu1 %v137_v10  ;;  %v916_v10 = vpack.i.bf16 %v1089_v9, %v1084_v8 }
 0x100   :  { %874 = vmatpush.xpose.msk.msra.mxu1 %vm62_vm1, %v191_v14 }
 0x101   :  { %v89_v15 = vpop.permute.xlu1 %88  ;;  %v321_v16 = vpop.permute.xlu2 %320 }
 0x102   :  { %870 = vmatpush.xpose.msk.msra.mxu2 %vm62_vm1, %v89_v15 }
 0x105   :  { %871 = vmatmul.msk.f32.vlgmr.msra.gmra.mxu2 %vm62_vm1, %v1089_v9 }
 0x106   :  { %876 = vmatpush.xpose.msk.msrb.mxu2 %vm62_vm1, %v219_v11 }
 0x109   :  { %v189_v17 = vpop.permute.xlu1 %188  ;;  %v319_v19 = vpop.permute.xlu2 %318 }
 0x10a   :  { %880 = vmatpush.xpose.msk.msra.mxu2 %vm62_vm1, %v321_v16 }
 0x10d   :  { %877 = vmatmul.msk.f32.vlgmr.msrb.gmra.mxu2 %vm62_vm1, %v217_v12 }
 0x111   :  { %v451_v18 = vpop.permute.xlu1 %450  ;;  %v449_v20 = vpop.permute.xlu2 %448 }
 0x112   :  { %886 = vmatpush.xpose.msk.msrb.mxu2 %vm62_vm1, %v451_v18 }
 0x115   :  { %881 = vmatmul.msk.f32.vlgmr.msra.gmra.mxu2 %vm62_vm1, %v319_v19 }
 0x119   :  { %v479_v38 = vpop.permute.xlu2 %478 }
 0x11d   :  { %887 = vmatmul.msk.f32.vlgmr.msrb.gmra.mxu2 %vm62_vm1, %v449_v20 }
 0x17a   :  { %v84_v21 = vpop.f32.mrf.mxu1 }
 0x17b   :  { %v114_v22 = vsel %vm62_vm1, %v84_v21, -inf }
 0x17c   :  { %115 = vmax.xlane.f32.xlu0 %v114_v22 }
 0x188   :  { %v111_v23 = vpop.f32.mrf.mxu2 }
 0x189   :  { %v117_v24 = vsel %vm62_vm1, %v111_v23, -inf }
 0x18a   :  { %118 = vmax.xlane.f32.xlu2 %v117_v24 }
 0x190   :  { %346 = vrot.lane.b32.xlu0 %v1089_v9, %s1005_s6  ;;  %v241_v25 = vpop.f32.mrf.mxu2 }
 0x191   :  { %v247_v33 = vsel %vm62_vm1, %v241_v25, -inf }
 0x192   :  { %248 = vmax.xlane.f32.xlu2 %v247_v33 }
 0x198   :  { %v343_v26 = vpop.f32.mrf.mxu2 }
 0x199   :  { %v374_v27 = vsel %vm62_vm1, %v343_v26, -inf }
 0x1a0   :  { %v473_v48 = vpop.f32.mrf.mxu2 }
 0x1a1   :  { %v504_v50 = vsel %vm62_vm1, %v473_v48, -inf }
 0x1ba   :  { %375 = vmax.xlane.f32.xlu0 %v374_v27 }
 0x1ef   :  { %v116_v28 = vpop.xlane.xlu0 %115 }
 0x1f0   :  { %v120_v29 = vsub.f32 %v84_v21, %v116_v28 }
 0x1f2   :  { %v122_v30 = vmul.f32 1.442695, %v120_v29 }
 0x1f4   :  { %931 = vpow2.f32 %v122_v30 }
 0x1fa   :  { %v932_v31 = vpop.eup %931 }
 0x1fb   :  { %v126_v32 = vsel %vm62_vm1, %v932_v31, 0.0 }
 0x1fc   :  { %127 = vadd.xlane.f32.xlu1 %v126_v32 }
 0x1fd   :  { %v119_v42 = vpop.xlane.xlu2 %118 }
 0x1fe   :  { %v121_v43 = vsub.f32 %v111_v23, %v119_v42 }
 0x200   :  { %v124_v46 = vmul.f32 1.442695, %v121_v43 }
 0x202   :  { %v347_v39 = vpop.permute.xlu0 %346 }
 0x205   :  { %v249_v54 = vpop.xlane.xlu2 %248 }
 0x206   :  { %v251_v56 = vsub.f32 %v241_v25, %v249_v54 }
 0x208   :  { %v254_v60 = vmul.f32 1.442695, %v251_v56 }
 0x215   :  { %348 = vrot.lane.b32.xlu1 %v1089_v9, %s1004_s5 }
 0x21d   :  { %476 = vrot.lane.b32.xlu1 %v1089_v9, %s1006_s7 }
 0x22d   :  { %v376_v47 = vpop.xlane.xlu0 %375 }
 0x22e   :  { %v380_v49 = vsub.f32 %v343_v26, %v376_v47 }
 0x230   :  { %v382_v53 = vmul.f32 1.442695, %v380_v49 }
 0x26f   :  { %v128_v34 = vpop.xlane.xlu1 %127 }
 0x270   :  { %933 = vrcp.f32 %v128_v34 }
 0x271   :  { %935 = vpow2.f32 %v124_v46 }
 0x272   :  { %937 = vpow2.f32 %v382_v53 }
 0x273   :  { %939 = vpow2.f32 %v254_v60 }
 0x276   :  { %v934_v35 = vpop.eup %933 }
 0x277   :  { %v134_v36 = vmul.f32 %v934_v35, %v932_v31  ;;  %v936_v55 = vpop.eup %935 }
 0x278   :  { %v129_v57 = vsel %vm62_vm1, %v936_v55, 0.0  ;;  %v1141_v61 = vpop.eup %937 }
 0x279   :  { %872 = vmatmul.msk.f32.vlgmr.msrb.gmra.mxu1 %vm62_vm1, %v134_v36  ;;  %v386_v62 = vsel %vm62_vm1, %v1141_v61, 0.0  ;;  %v940_v63 = vpop.eup %939 }
 0x27a   :  { %v259_v11 = vsel %vm62_vm1, %v940_v63, 0.0 }
 0x281   :  { %875 = vmatmul.msk.f32.vlgmr.msra.gmra.mxu1 %vm62_vm1, %v189_v17 }
 0x287   :  { %v349_v37 = vpop.permute.xlu1 %348 }
 0x288   :  { %882 = vmatpush.xpose.msk.msrb.mxu0 %vm62_vm1, %v349_v37 }
 0x28b   :  { %883 = vmatmul.msk.f32.vlgmr.msrb.gmra.mxu0 %vm62_vm1, %v347_v39 }
 0x28c   :  { %888 = vmatpush.xpose.msk.msra.mxu0 %vm62_vm1, %v479_v38 }
 0x28f   :  { %v477_v40 = vpop.permute.xlu1 %476 }
 0x293   :  { %889 = vmatmul.msk.f32.vlgmr.msra.gmra.mxu0 %vm62_vm1, %v477_v40 }
 0x2f6   :  { %v1134_v41 = vpop.f32.mrf.mxu1 }
 0x2fe   :  { %v213_v44 = vpop.f32.mrf.mxu1 }
 0x2ff   :  { %v244_v45 = vsel %vm62_vm1, %v213_v44, -inf }
 0x300   :  { %245 = vmax.xlane.f32.xlu1 %v244_v45 }
 0x308   :  { %505 = vmax.xlane.f32.xlu1 %v504_v50  ;;  %v371_v51 = vpop.f32.mrf.mxu0 }
 0x309   :  { %v377_v52 = vsel %vm62_vm1, %v371_v51, -inf }
 0x30a   :  { %378 = vmax.xlane.f32.xlu0 %v377_v52 }
 0x310   :  { %130 = vadd.xlane.f32.xlu1 %v129_v57  ;;  %v501_v58 = vpop.f32.mrf.mxu0 }
 0x311   :  { %v507_v59 = vsel %vm62_vm1, %v501_v58, -inf }
 0x312   :  { %508 = vmax.xlane.f32.xlu2 %v507_v59 }
 0x318   :  { %387 = vadd.xlane.f32.xlu1 %v386_v62 }
 0x31e   :  { %917 = vrot.lane.b32.xlu0 %v916_v10, %s1007_s8 }
 0x320   :  { %260 = vadd.xlane.f32.xlu1 %v259_v11 }
 0x326   :  { %526 = vrot.lane.b32.xlu0 %v1084_v8, %s1008_s9 }
 0x32a   :  { %162 = vrot.lane.b32.xlu2 %v1089_v9, %s999_s27 }
 0x332   :  { %396 = vrot.lane.b32.xlu2 %v1084_v8, %s1009_s10 }
 0x373   :  { %v246_v12 = vpop.xlane.xlu1 %245 }
 0x374   :  { %v250_v13 = vsub.f32 %v213_v44, %v246_v12 }
 0x376   :  { %v252_v14 = vmul.f32 1.442695, %v250_v13 }
 0x378   :  { %941 = vpow2.f32 %v252_v14 }
 0x37b   :  { %v506_v15 = vpop.xlane.xlu1 %505 }
 0x37c   :  { %v510_v16 = vsub.f32 %v473_v48, %v506_v15 }
 0x37d   :  { %v379_v17 = vpop.xlane.xlu0 %378 }
 0x37e   :  { %v942_v18 = vpop.eup %941  ;;  %v512_v19 = vmul.f32 1.442695, %v510_v16  ;;  %v381_v20 = vsub.f32 %v371_v51, %v379_v17 }
 0x37f   :  { %v256_v21 = vsel %vm62_vm1, %v942_v18, 0.0 }
 0x380   :  { %943 = vpow2.f32 %v512_v19  ;;  %257 = vadd.xlane.f32.xlu0 %v256_v21  ;;  %v384_v22 = vmul.f32 1.442695, %v381_v20 }
 0x383   :  { %v131_v23 = vpop.xlane.xlu1 %130 }
 0x384   :  { %945 = vrcp.f32 %v131_v23 }
 0x385   :  { %v509_v24 = vpop.xlane.xlu2 %508  ;;  %947 = vpow2.f32 %v384_v22 }
 0x386   :  { %v944_v25 = vpop.eup %943  ;;  %v511_v8 = vsub.f32 %v501_v58, %v509_v24 }
 0x387   :  { %v516_v26 = vsel %vm62_vm1, %v944_v25, 0.0 }
 0x388   :  { %v514_v27 = vmul.f32 1.442695, %v511_v8  ;;  %517 = vadd.xlane.f32.xlu1 %v516_v26 }
 0x38a   :  { %v946_v28 = vpop.eup %945  ;;  %949 = vpow2.f32 %v514_v27 }
 0x38b   :  { %v388_v29 = vpop.xlane.xlu1 %387  ;;  %v948_v30 = vpop.eup %947  ;;  %v135_v32 = vmul.f32 %v946_v28, %v936_v55 }
 0x38c   :  { %v389_v33 = vsel %vm62_vm1, %v948_v30, 0.0 }
 0x38d   :  { %v163_v31 = vpop.permute.xlu2 %162 }
 0x38e   :  { %183 = vmatpush.msra.mxu3 %v163_v31 }
 0x38f   :  { %873 = vmatmul.msk.f32.vlgmr.msra.gmra.mxu3 %vm62_vm1, %v135_v32 }
 0x390   :  { %v950_v34 = vpop.eup %949  ;;  %v918_v35 = vpop.permute.xlu0 %917  ;;  %390 = vadd.xlane.f32.xlu1 %v389_v33 }
 0x391   :  { %v920_v36 = vunpack.i.h.bf16 %v918_v35  ;;  %v519_v37 = vsel %vm62_vm1, %v950_v34, 0.0  ;;  %v919_v38 = vunpack.i.l.bf16 %v918_v35 }
 0x392   :  { %520 = vadd.xlane.f32.xlu2 %v519_v37 }
 0x393   :  { %287 = vmatpush.msrb.mxu3 %v919_v38  ;;  %313 = vmatpush.msrb.mxu1 %v920_v36  ;;  %v261_v39 = vpop.xlane.xlu1 %260  ;;  %v1014_v36 = vmov 32.0  }
 0x394   :  { %951 = vrcp.f32 %v261_v39  ;;  %552 = vrot.lane.b32.xlu0 %v1089_v9, %s1008_s9 }
 0x395   :  { %v397_v40 = vpop.permute.xlu2 %396 }
 0x396   :  { %417 = vmatpush.msra.mxu3 %v397_v40 }
 0x398   :  { %v527_v44 = vpop.permute.xlu0 %526 }
 0x39a   :  { %v952_v42 = vpop.eup %951 }
 0x39b   :  { %v265_v43 = vmul.f32 %v952_v42, %v940_v63 }
 0x39c   :  { %922 = vrot.lane.b32.xlu0 %v921_v2, %s1010_s11 }
 0x39d   :  { %879 = vmatmul.msk.f32.vlgmr.msrb.gmra.mxu1 %vm62_vm1, %v265_v43  ;;  %v25_v43 = vld [vmem:[%s1272_s1 + $0x28] sm:$0xff] }
 0x3a4   :  { %927 = vrot.lane.b32.xlu0 %v926_v5, %s1010_s11 }
 0x3a9   :  { %422 = vrot.lane.b32.xlu1 %v1089_v9, %s1009_s10 }
 0x3f3   :  { %v258_v45 = vpop.xlane.xlu0 %257 }
 0x3f4   :  { %953 = vrcp.f32 %v258_v45  ;;  %v23_v45 = vld [vmem:[%s1272_s1 + $0x18] sm:$0xff] }
 0x3f5   :  { %955 = vrcp.f32 %v388_v29 }
 0x3fa   :  { %v954_v46 = vpop.eup %953 }
 0x3fb   :  { %v264_v47 = vmul.f32 %v954_v46, %v942_v18  ;;  %v518_v48 = vpop.xlane.xlu1 %517  ;;  %v956_v49 = vpop.eup %955 }
 0x3fc   :  { %957 = vrcp.f32 %v518_v48  ;;  %v394_v0 = vmul.f32 %v956_v49, %v1141_v61 }
 0x3fd   :  { %878 = vmatmul.msk.f32.vlgmr.msrb.gmra.mxu3 %vm62_vm1, %v264_v47  ;;  %v21_v47 = vld [vmem:[%s1272_s1 + $0x8] sm:$0xff] }
 0x3fe   :  { %547 = vmatpush.msrb.mxu3 %v527_v44 }
 0x402   :  { %v958_v1 = vpop.eup %957 }
 0x403   :  { %v524_v2 = vmul.f32 %v958_v1, %v944_v25  ;;  %v391_v3 = vpop.xlane.xlu1 %390  ;;  %v1186_v25 = vld [vmem:[%s1274_s3] sm:$0xff]  ;;  %s1016_s3 = smov 128  }
 0x404   :  { %959 = vrcp.f32 %v391_v3 }
 0x405   :  { %884 = vmatmul.msk.f32.vlgmr.msra.gmra.mxu3 %vm62_vm1, %v394_v0  ;;  %v521_v4 = vpop.xlane.xlu2 %520 }
 0x406   :  { %961 = vrcp.f32 %v521_v4  ;;  %v553_v51 = vpop.permute.xlu0 %552 }
 0x407   :  { %963 = vrcp.f32 %v1014_v36 }
 0x40a   :  { %v960_v5 = vpop.eup %959 }
 0x40b   :  { %v395_v9 = vmul.f32 %v960_v5, %v948_v30 }
 0x40c   :  { %v962_v52 = vpop.eup %961 }
 0x40d   :  { %890 = vmatmul.msk.f32.vlgmr.msrb.gmra.mxu3 %vm62_vm1, %v524_v2  ;;  %v525_v53 = vmul.f32 %v962_v52, %v950_v34  ;;  %v964_v37 = vpop.eup %963  ;;  %v758_v52 = vld [vmem:[%s1273_s2 + $0x38] sm:$0xff] }
 0x40e   :  { %v923_v56 = vpop.permute.xlu0 %922  ;;  %v665_v38 = vmul.f32 32.0, %v964_v37  ;;  %vm669_vm4 = vweird.f32 %v964_v37  ;;  %775 = vmatpush.msra.mxu3 %v758_v52 }
 0x40f   :  { %v925_v57 = vunpack.i.h.bf16 %v923_v56  ;;  %v924_v58 = vunpack.i.l.bf16 %v923_v56 }
 0x410   :  { %v666_v39 = vsub.f32 1.0, %v665_v38 }
 0x411   :  { %645 = vmatpush.msra.mxu2 %v924_v58  ;;  %v756_v58 = vld [vmem:[%s1273_s2 + $0x28] sm:$0xff] }
 0x412   :  { %v185_v54 = vpop.f32.mrf.mxu3  ;;  %v667_v40 = vmul.f32 %v964_v37, %v666_v39 }
 0x413   :  { %646 = vmatpush.msra.mxu2 %v925_v57 }
 0x414   :  { %v668_v42 = vadd.f32 %v964_v37, %v667_v40 }
 0x416   :  { %v928_v60 = vpop.permute.xlu0 %927  ;;  %v1211_v44 = vsel %vm669_vm4, %v964_v37, %v668_v42  ;;  %v759_v37 = vperm.slane %v1186_v25, 2 }
 0x417   :  { %v930_v61 = vunpack.i.h.bf16 %v928_v60  ;;  %v929_v62 = vunpack.i.l.bf16 %v928_v60 }
 0x419   :  { %647 = vmatpush.msra.mxu2 %v929_v62 }
 0x41a   :  { %v315_v63 = vpop.f32.mrf.mxu1 }
 0x41b   :  { %v423_v50 = vpop.permute.xlu1 %422  ;;  %648 = vmatpush.msra.mxu2 %v930_v61  ;;  %v755_v61 = vld [vmem:[%s1273_s2 + $0x20] sm:$0xff] }
 0x41c   :  { %443 = vmatpush.msra.mxu1 %v423_v50 }
 0x41d   :  { %885 = vmatmul.msk.f32.vlgmr.msra.gmra.mxu1 %vm62_vm1, %v395_v9 }
 0x41e   :  { %573 = vmatpush.msrb.mxu1 %v553_v51 }
 0x425   :  { %891 = vmatmul.msk.f32.vlgmr.msrb.gmra.mxu1 %vm62_vm1, %v525_v53  ;;  %v757_v53 = vld [vmem:[%s1273_s2 + $0x30] sm:$0xff] }
 0x426   :  { %776 = vmatpush.msra.mxu3 %v757_v53 }
 0x428   :  { %777 = vmatpush.msra.mxu3 %v756_v58 }
 0x42a   :  { %778 = vmatpush.msra.mxu3 %v755_v61 }
 0x480   :  { %v289_v55 = vpop.f32.mrf.mxu3 }
 0x481   :  { %580 = vrot.lane.b32.xlu0 %v289_v55, %s1011_s12 }
 0x488   :  { %v419_v59 = vpop.f32.mrf.mxu3 }
 0x489   :  { %588 = vrot.lane.b32.xlu1 %v419_v59, %s1012_s13 }
 0x490   :  { %v549_v10 = vpop.f32.mrf.mxu3 }
 0x491   :  { %582 = vrot.lane.b32.xlu1 %v315_v63, %s1011_s12  ;;  %596 = vrot.lane.b32.xlu0 %v549_v10, %s1013_s14  ;;  %v713_v10 = vperm.slane %v1186_v25, 3 }
 0x49a   :  { %v445_v11 = vpop.f32.mrf.mxu1 }
 0x49b   :  { %590 = vrot.lane.b32.xlu2 %v445_v11, %s1012_s13 }
 0x4a2   :  { %v575_v12 = vpop.f32.mrf.mxu1 }
 0x4a3   :  { %598 = vrot.lane.b32.xlu0 %v575_v12, %s1013_s14  ;;  %v754_v12 = vld [vmem:[%s1273_s2 + $0x18] sm:$0xff] }
 0x4a4   :  { %779 = vmatpush.msra.mxu3 %v754_v12 }
 0x4f3   :  { %v581_v13 = vpop.permute.xlu0 %580 }
 0x4f4   :  { %v602_v15 = vsel %vm62_vm1, %v1134_v41, %v581_v13  ;;  %v610_v41 = vperm.slane %v1186_v25, 0 }
 0x4f5   :  { %v591_v21 = vpop.permute.xlu2 %590 }
 0x4fb   :  { %v589_v14 = vpop.permute.xlu1 %588 }
 0x4fc   :  { %v605_v16 = vsel %vm604_vm2, %v602_v15, %v589_v14  ;;  %v716_v15 = vperm.slane %v1186_v25, 4 }
 0x503   :  { %v597_v17 = vpop.permute.xlu0 %596  ;;  %v583_v19 = vpop.permute.xlu1 %582 }
 0x504   :  { %v608_v18 = vsel %vm607_vm3, %v605_v16, %v597_v17  ;;  %v603_v20 = vsel %vm62_vm1, %v185_v54, %v583_v19 }
 0x505   :  { %892 = vmatmul.msk.f32.vlgmr.msra.gmra.mxu2 %vm29_vm0, %v608_v18  ;;  %v606_v23 = vsel %vm604_vm2, %v603_v20, %v591_v21 }
 0x515   :  { %v599_v22 = vpop.permute.xlu0 %598 }
 0x516   :  { %v609_v24 = vsel %vm607_vm3, %v606_v23, %v599_v22 }
 0x517   :  { %893 = vmatmul.msk.f32.gmra.mxu2 %vm29_vm0, %v609_v24 }
 0x588   :  { %v650_v8 = vpop.f32.mrf.mxu2 }
 0x589   :  { %v651_v26 = vadd.f32 %v650_v8, %v610_v41 }
 0x58b   :  { %v1190_v27 = vadd.f32 %v651_v26, %v1072_v6 }
 0x58d   :  { %v658_v28 = vsel %vm29_vm0, %v1190_v27, 0.0  ;;  %v673_v29 = vmul.f32 %v1190_v27, %v1190_v27 }
 0x58e   :  { %659 = vadd.xlane.f32.xlu1 %v658_v28  ;;  %v753_v28 = vld [vmem:[%s1273_s2 + $0x10] sm:$0xff] }
 0x58f   :  { %v675_v30 = vsel %vm29_vm0, %v673_v29, 0.0  ;;  %780 = vmatpush.msra.mxu3 %v753_v28  ;;  %v752_v29 = vld [vmem:[%s1273_s2 + $0x8] sm:$0xff] }
 0x590   :  { %676 = vadd.xlane.f32.xlu0 %v675_v30  ;;  %v751_v30 = vld [vmem:[%s1273_s2] sm:$0xff]  ;;  %s1015_s2 = smov [#allocation2]  }
 0x591   :  { %781 = vmatpush.msra.mxu3 %v752_v29  ;;  %s852_s13 = sshll.u32 %s1015_s2, 4  ;;  %s853_s13 = int_to_ptr.vmem [resolvable:$true] %s852_s13 }
 0x593   :  { %782 = vmatpush.msra.mxu3 %v751_v30 }
 0x59a   :  { %v653_v31 = vpop.f32.mrf.mxu2 }
 0x59b   :  { %v654_v32 = vadd.f32 %v653_v31, %v610_v41  ;;  %v719_v31 = vperm.slane %v1186_v25, 1 }
 0x59d   :  { %v1198_v33 = vadd.f32 %v654_v32, %v1080_v7  ;;  %v27_v7 = vld [vmem:[%s1272_s1 + $0x38] sm:$0xff] }
 0x59e   :  { %738 = vmatpush.msrb.mxu0 %v27_v7 }
 0x59f   :  { %v661_v34 = vsel %vm29_vm0, %v1198_v33, 0.0  ;;  %v674_v6 = vmul.f32 %v1198_v33, %v1198_v33 }
 0x5a0   :  { %662 = vadd.xlane.f32.xlu2 %v661_v34  ;;  %739 = vmatpush.msrb.mxu0 %v25_v43 }
 0x5a1   :  { %v678_v35 = vsel %vm29_vm0, %v674_v6, 0.0 }
 0x5a2   :  { %679 = vadd.xlane.f32.xlu1 %v678_v35  ;;  %740 = vmatpush.msrb.mxu0 %v23_v45 }
 0x5a4   :  { %741 = vmatpush.msrb.mxu0 %v21_v47 }
 0x601   :  { %v660_v46 = vpop.xlane.xlu1 %659 }
 0x602   :  { %v671_v48 = vmul.f32 %v1211_v44, %v660_v46 }
 0x603   :  { %v677_v49 = vpop.xlane.xlu0 %676 }
 0x604   :  { %v683_v0 = vmul.f32 %v671_v48, %v671_v48  ;;  %v681_v1 = vmul.f32 %v677_v49, %v1211_v44  ;;  %v687_v63 = vsub.f32 %v1190_v27, %v671_v48 }
 0x606   :  { %v685_v2 = vsub.f32 %v681_v1, %v683_v0 }
 0x608   :  { %v689_v3 = vadd.f32 1e-06, %v685_v2 }
 0x60a   :  { %965 = vrsqrt.f32 %v689_v3  ;;  %vm697_vm6 = vweird.f32 %v689_v3 }
 0x610   :  { %v966_v4 = vpop.eup %965 }
 0x611   :  { %v692_v5 = vmul.f32 %v966_v4, %v689_v3  ;;  %vm698_vm5 = vweird.f32 %v966_v4 }
 0x612   :  { %vm699_vm7 = vmor %vm697_vm6, %vm698_vm5 }
 0x613   :  { %v693_v9 = vmul.f32 %v966_v4, %v692_v5  ;;  %v663_v50 = vpop.xlane.xlu2 %662 }
 0x614   :  { %v672_v51 = vmul.f32 %v1211_v44, %v663_v50 }
 0x615   :  { %v694_v54 = vmul.f32 0.5, %v693_v9  ;;  %v680_v55 = vpop.xlane.xlu1 %679 }
 0x616   :  { %v684_v56 = vmul.f32 %v672_v51, %v672_v51  ;;  %v682_v57 = vmul.f32 %v680_v55, %v1211_v44  ;;  %v688_v24 = vsub.f32 %v1198_v33, %v672_v51 }
 0x617   :  { %v695_v59 = vsub.f32 1.5, %v694_v54 }
 0x618   :  { %v686_v60 = vsub.f32 %v682_v57, %v684_v56 }
 0x619   :  { %v696_v62 = vmul.f32 %v966_v4, %v695_v59 }
 0x61a   :  { %v690_v11 = vadd.f32 1e-06, %v686_v60 }
 0x61b   :  { %v700_v13 = vsel %vm699_vm7, %v966_v4, %v696_v62 }
 0x61c   :  { %v711_v14 = vmul.f32 %v700_v13, %v687_v63  ;;  %967 = vrsqrt.f32 %v690_v11  ;;  %vm707_vm9 = vweird.f32 %v690_v11 }
 0x61e   :  { %v714_v16 = vmul.f32 %v713_v10, %v711_v14  ;;  %v843_v14 = vperm.slane %v1186_v25, 6 }
 0x620   :  { %v717_v17 = vadd.f32 %v716_v15, %v714_v16 }
 0x622   :  { %v968_v18 = vpop.eup %967  ;;  %894 = vmatmul.msk.f32.vlgmr.msrb.gmra.mxu0 %vm29_vm0, %v717_v17 }
 0x623   :  { %v702_v19 = vmul.f32 %v968_v18, %v690_v11  ;;  %vm708_vm8 = vweird.f32 %v968_v18 }
 0x624   :  { %vm709_vm10 = vmor %vm707_vm9, %vm708_vm8 }
 0x625   :  { %v703_v20 = vmul.f32 %v968_v18, %v702_v19 }
 0x627   :  { %v704_v21 = vmul.f32 0.5, %v703_v20 }
 0x629   :  { %v705_v22 = vsub.f32 1.5, %v704_v21 }
 0x62b   :  { %v706_v23 = vmul.f32 %v968_v18, %v705_v22 }
 0x62d   :  { %v710_v41 = vsel %vm709_vm10, %v968_v18, %v706_v23 }
 0x62e   :  { %v712_v8 = vmul.f32 %v710_v41, %v688_v24 }
 0x630   :  { %v715_v26 = vmul.f32 %v713_v10, %v712_v8  ;;  %v840_v10 = vperm.slane %v1186_v25, 5 }
 0x632   :  { %v718_v27 = vadd.f32 %v716_v15, %v715_v26 }
 0x634   :  { %895 = vmatmul.msk.f32.gmra.mxu0 %vm29_vm0, %v718_v27 }
 0x69f   :  { %v743_v32 = vpop.f32.mrf.mxu0 }
 0x6a0   :  { %v744_v33 = vadd.f32 %v743_v32, %v719_v31 }
 0x6a2   :  { %v749_v34 = vmax.f32 %v744_v33, 0.0 }
 0x6a4   :  { %896 = vmatmul.msk.f32.vlgmr.msra.gmra.mxu3 %vm760_vm11, %v749_v34 }
 0x6b1   :  { %v746_v6 = vpop.f32.mrf.mxu0 }
 0x6b2   :  { %v747_v35 = vadd.f32 %v746_v6, %v719_v31 }
 0x6b4   :  { %v750_v36 = vmax.f32 %v747_v35, 0.0 }
 0x6b6   :  { %897 = vmatmul.msk.f32.gmra.mxu3 %vm760_vm11, %v750_v36 }
 0x727   :  { %v784_v38 = vpop.f32.mrf.mxu3 }
 0x728   :  { %v785_v39 = vadd.f32 %v784_v38, %v759_v37 }
 0x72a   :  { %v790_v40 = vadd.f32 %v785_v39, %v717_v17 }
 0x72c   :  { %v792_v42 = vsel %vm29_vm0, %v790_v40, 0.0  ;;  %v800_v7 = vmul.f32 %v790_v40, %v790_v40 }
 0x72d   :  { %793 = vadd.xlane.f32.xlu0 %v792_v42 }
 0x72e   :  { %v802_v43 = vsel %vm29_vm0, %v800_v7, 0.0 }
 0x735   :  { %803 = vadd.xlane.f32.xlu0 %v802_v43 }
 0x739   :  { %v787_v45 = vpop.f32.mrf.mxu3 }
 0x73a   :  { %v788_v46 = vadd.f32 %v787_v45, %v759_v37 }
 0x73c   :  { %v791_v47 = vadd.f32 %v788_v46, %v718_v27 }
 0x73e   :  { %v795_v48 = vsel %vm29_vm0, %v791_v47, 0.0  ;;  %v801_v49 = vmul.f32 %v791_v47, %v791_v47 }
 0x73f   :  { %796 = vadd.xlane.f32.xlu1 %v795_v48 }
 0x740   :  { %v805_v0 = vsel %vm29_vm0, %v801_v49, 0.0 }
 0x747   :  { %806 = vadd.xlane.f32.xlu1 %v805_v0 }
 0x7a0   :  { %v794_v1 = vpop.xlane.xlu0 %793 }
 0x7a1   :  { %v798_v2 = vmul.f32 %v794_v1, %v1211_v44 }
 0x7a3   :  { %v810_v4 = vmul.f32 %v798_v2, %v798_v2  ;;  %v814_v63 = vsub.f32 %v790_v40, %v798_v2 }
 0x7a8   :  { %v804_v3 = vpop.xlane.xlu0 %803 }
 0x7a9   :  { %v808_v5 = vmul.f32 %v804_v3, %v1211_v44 }
 0x7ab   :  { %v812_v9 = vsub.f32 %v808_v5, %v810_v4 }
 0x7ad   :  { %v816_v50 = vadd.f32 1e-06, %v812_v9 }
 0x7af   :  { %969 = vrsqrt.f32 %v816_v50  ;;  %vm824_vm13 = vweird.f32 %v816_v50 }
 0x7b2   :  { %v797_v51 = vpop.xlane.xlu1 %796 }
 0x7b3   :  { %v799_v54 = vmul.f32 %v797_v51, %v1211_v44 }
 0x7b5   :  { %v970_v52 = vpop.eup %969  ;;  %v811_v58 = vmul.f32 %v799_v54, %v799_v54  ;;  %v815_v22 = vsub.f32 %v791_v47, %v799_v54 }
 0x7b6   :  { %v819_v53 = vmul.f32 %v970_v52, %v816_v50  ;;  %vm825_vm12 = vweird.f32 %v970_v52 }
 0x7b7   :  { %vm826_vm14 = vmor %vm824_vm13, %vm825_vm12 }
 0x7b8   :  { %v820_v55 = vmul.f32 %v970_v52, %v819_v53 }
 0x7ba   :  { %v821_v56 = vmul.f32 0.5, %v820_v55  ;;  %v807_v57 = vpop.xlane.xlu1 %806 }
 0x7bb   :  { %v809_v59 = vmul.f32 %v807_v57, %v1211_v44 }
 0x7bc   :  { %v822_v60 = vsub.f32 1.5, %v821_v56 }
 0x7bd   :  { %v813_v61 = vsub.f32 %v809_v59, %v811_v58 }
 0x7be   :  { %v823_v62 = vmul.f32 %v970_v52, %v822_v60 }
 0x7bf   :  { %v817_v11 = vadd.f32 1e-06, %v813_v61 }
 0x7c0   :  { %v827_v12 = vsel %vm826_vm14, %v970_v52, %v823_v62 }
 0x7c1   :  { %v838_v13 = vmul.f32 %v827_v12, %v814_v63  ;;  %971 = vrsqrt.f32 %v817_v11  ;;  %vm834_vm1 = vweird.f32 %v817_v11 }
 0x7c3   :  { %v841_v15 = vmul.f32 %v840_v10, %v838_v13 }
 0x7c5   :  { %v844_v16 = vadd.f32 %v843_v14, %v841_v15 }
 0x7c7   :  { %v972_v17 = vpop.eup %971  ;;  %846 = vst.msk [vmem:[#allocation2] sm:$0xff] %vm29_vm0, %v844_v16 }
 0x7c8   :  { %v829_v44 = vmul.f32 %v972_v17, %v817_v11  ;;  %vm835_vm15 = vweird.f32 %v972_v17 }
 0x7c9   :  { %vm836_vm2 = vmor %vm834_vm1, %vm835_vm15 }
 0x7ca   :  { %v830_v18 = vmul.f32 %v972_v17, %v829_v44 }
 0x7cc   :  { %v831_v19 = vmul.f32 0.5, %v830_v18 }
 0x7ce   :  { %v832_v20 = vsub.f32 1.5, %v831_v19 }
 0x7d0   :  { %v833_v21 = vmul.f32 %v972_v17, %v832_v20 }
 0x7d2   :  { %v837_v23 = vsel %vm836_vm2, %v972_v17, %v833_v21 }
 0x7d3   :  { %v839_v24 = vmul.f32 %v837_v23, %v815_v22 }
 0x7d5   :  { %v842_v25 = vmul.f32 %v840_v10, %v839_v24 }
 0x7d7   :  { %v845_v41 = vadd.f32 %v843_v14, %v842_v25 }
 0x7d9   :  { %847 = vst.msk [vmem:[#allocation2 + $0x8] sm:$0xff] %vm29_vm0, %v845_v41 }
 0x7da   :  { %860 = dma.vmem_to_hbm [thread:$0]  %s853_s13, 256, %s855_s16, [#allocation3], %s1016_s3, %s1016_s3, %s1011_s12  }
 0x7db   :  { %997 = dma.done.wait [#allocation3], 256  }
 0x7dc   :  { %998 = vsyncadd [#allocation3], 4294967040 }
 0x7dd   :  { %865 = vsyncpa [#allocation3], 1 }

</bundles_post_ra>
